<compile_context>
chip_gen: v7x
topology: tpu7x:2x2x1
jax: 0.10.0
libtpu: 0.0.40
codegen_flags: <defaults>
</compile_context>

<pallas_src>
import numpy as np

import jax
import jax.numpy as jnp
from jax.experimental import pallas as pl
from jax.experimental.pallas import tpu as pltpu


_LANE = 128


def _round_up(x, m):
    return ((x + m - 1) // m) * m


def _sublane(dtype):
    # sublane packing: 8 rows for 4-byte, 16 for 2-byte, 32 for 1-byte dtypes
    return {4: 8, 2: 16, 1: 32}[jnp.dtype(dtype).itemsize]


def _pick_tile(dim, tile_default, align):
    """Padding-aware tile selection.

    Number of tiles = ceil(dim / default); the tile is then shrunk to the
    smallest `align`-aligned size that covers dim, minimizing pad waste
    (e.g. dim=300, default=512 -> tile=304, padded=304, 1 tile)."""
    tile_default = max(_round_up(tile_default, align), align)
    g = max(1, -(-dim // tile_default))
    tile = _round_up(-(-dim // g), align)
    return tile, g * tile


def _vmem_limit_bytes():
    cap = 64 * 1024 * 1024  # conservative fallback (v7x: 64 MiB per TC)
    try:
        info = pltpu.get_tpu_info()
        cap = getattr(info, "vmem_capacity_bytes", cap) or cap
    except Exception:
        pass
    # Leave 1/4 headroom for compiler-internal scratch:
    # ~96 MiB on v5e/v6e (128 MiB physical), ~48 MiB on v7x (64 MiB physical).
    return int(cap * 3 // 4)


def _make_linear_kernel(multi_k, emit_state):
    """Build the kernel body for (multi-K vs single-K) x (with/without state)."""

    def kernel(x_ref, w_ref, *refs):
        if emit_state:
            o_ref, s_ref, *scratch = refs
        else:
            o_ref, *scratch = refs
            s_ref = None

        def epilogue(acc):
            o_ref[...] = acc.astype(o_ref.dtype)
            if emit_state:
                # TODO(synk): reset_state()/activation() are abstract on
                # BaseLinear (defined by concrete spiking subclasses). A
                # concrete subclass should fuse its real state init / spike
                # function here, on the fp32 accumulator, instead of this
                # zero-state placeholder.
                s_ref[...] = jnp.zeros_like(s_ref)

        # Weight was pre-transposed once to (D_in, D_out): plain MXU matmul,
        # no per-step transpose, bf16 inputs with fp32 accumulation.
        part = jnp.dot(x_ref[...], w_ref[...],
                       preferred_element_type=jnp.float32)

        if multi_k:
            acc_ref = scratch[0]
            k = pl.program_id(2)

            @pl.when(k == 0)
            def _():
                acc_ref[...] = part          # overwrite: no zero-fill pass

            @pl.when(k > 0)
            def _():
                acc_ref[...] += part

            @pl.when(k == pl.num_programs(2) - 1)
            def _():
                epilogue(acc_ref[...])
        else:
            epilogue(part)                   # single-K fast path: no scratch

    return kernel


def prepare_weight(weight, *, tn=512, tk=2048, compute_dtype=jnp.bfloat16):
    """One-time (parameter-load-time) weight layout for base_linear_ff.

    Takes the PyTorch nn.Linear weight (D_out, D_in), casts it to the MXU
    compute dtype, transposes it to (D_in, D_out), and zero-pads N/K to the
    chosen tiles -- all exactly once, so every forward streams the weight from
    HBM with no per-call pad/transpose ops."""
    d_out, d_in = weight.shape
    tn, n_p = _pick_tile(d_out, tn, _LANE)
    tk, k_p = _pick_tile(d_in, tk, _LANE)
    w = weight.astype(compute_dtype).T          # (D_in, D_out)
    if (k_p, n_p) != (d_in, d_out):
        w = jnp.pad(w, ((0, k_p - d_in), (0, n_p - d_out)))
    return {
        "w": w, "d_out": d_out, "d_in": d_in,
        "tn": tn, "tk": tk, "n_p": n_p, "k_p": k_p,
        "compute_dtype": jnp.dtype(compute_dtype),
    }


def base_linear_ff(x, prepared, *, tm=512, emit_state=False):
    """ff = x @ W.T (nn.Linear, bias=False) with W pre-laid-out by
    prepare_weight().  Leading dims of x are flattened into M so callers can
    stack timesteps (T, B, D_in) to amortize the weight stream."""
    w = prepared["w"]
    d_out, d_in = prepared["d_out"], prepared["d_in"]
    tn, tk = prepared["tn"], prepared["tk"]
    n_p, k_p = prepared["n_p"], prepared["k_p"]
    cdt = prepared["compute_dtype"]

    *lead, d_in_x = x.shape
    assert d_in_x == d_in, "weight/input feature mismatch"
    out_dtype = x.dtype

    m = 1
    for s in lead:
        m *= s
    sub = _sublane(cdt)

    x2 = x.reshape(m, d_in).astype(cdt)

    tm, m_p = _pick_tile(m, tm, sub)
    gm, gn, gk = m_p // tm, n_p // tn, k_p // tk

    # v7x has 2 TensorCores: if the grid collapses to a single "parallel" tile
    # but the matmul is big enough to be MXU-bound, split M in two so both
    # cores get work (costs one extra weight stream).
    if gm == 1 and gn == 1 and m > sub and 2 * m * d_out * d_in >= (1 << 30):
        tm = _round_up(-(-m // 2), sub)
        m_p, gm = 2 * tm, 2

    # Only the (small) activation is padded per call, and only when ragged;
    # the weight was padded once in prepare_weight().
    if (m_p, k_p) != (m, d_in):
        x2 = jnp.pad(x2, ((0, m_p - m), (0, k_p - d_in)))

    multi_k = gk > 1
    if multi_k:
        grid = (gm, gn, gk)
        in_specs = [
            pl.BlockSpec((tm, tk), lambda i, j, k: (i, k)),   # activations
            pl.BlockSpec((tk, tn), lambda i, j, k: (k, j)),   # weight (in,out)
        ]
        out_block = pl.BlockSpec((tm, tn), lambda i, j, k: (i, j))
        scratch = [pltpu.VMEM((tm, tn), jnp.float32)]
        dims = ("parallel", "parallel", "arbitrary")
    else:
        grid = (gm, gn)
        in_specs = [
            pl.BlockSpec((tm, tk), lambda i, j: (i, 0)),
            pl.BlockSpec((tk, tn), lambda i, j: (0, j)),
        ]
        out_block = pl.BlockSpec((tm, tn), lambda i, j: (i, j))
        scratch = []
        dims = ("parallel", "parallel")

    out_shapes = [jax.ShapeDtypeStruct((m_p, n_p), out_dtype)]
    out_specs = [out_block]
    if emit_state:
        out_shapes.append(jax.ShapeDtypeStruct((m_p, n_p), out_dtype))
        out_specs.append(out_block)

    c_item = cdt.itemsize
    o_item = jnp.dtype(out_dtype).itemsize
    n_out = 2 if emit_state else 1
    cost = pl.CostEstimate(
        flops=2 * m_p * n_p * k_p,
        transcendentals=0,
        bytes_accessed=(
            gn * m_p * k_p * c_item          # x re-streamed once per N tile
            + gm * k_p * n_p * c_item        # W re-streamed once per M tile
            + n_out * m_p * n_p * o_item     # output (+ fused zero state)
        ),
    )

    results = pl.pallas_call(
        _make_linear_kernel(multi_k, emit_state),
        out_shape=tuple(out_shapes),
        grid_spec=pltpu.PrefetchScalarGridSpec(
            num_scalar_prefetch=0,
            grid=grid,
            in_specs=in_specs,
            out_specs=tuple(out_specs),
            scratch_shapes=scratch,
        ),
        compiler_params=pltpu.CompilerParams(
            dimension_semantics=dims,
            vmem_limit_bytes=_vmem_limit_bytes(),
        ),
        cost_estimate=cost,
    )(x2, w)

    def unpad(a):
        return a[:m, :d_out].reshape(*lead, d_out)

    if emit_state:
        return unpad(results[0]), unpad(results[1])
    return unpad(results[0])


def base_linear_forward(state, input_, weight, *, tm=512, tn=512, tk=2048,
                        compute_dtype=jnp.bfloat16):
    """Mirrors BaseLinear.forward(state, input_):
        ff = self.ff(input_)
        state = state if state is not None else self.reset_state(ff)
        state, output = self.activation(state, ff)
        return (state, output)

    `weight` is either the raw PyTorch (D_out, D_in) array or the dict
    returned by prepare_weight() (preferred: prepare once at load time)."""
    prepared = weight if isinstance(weight, dict) else prepare_weight(
        weight, tn=tn, tk=tk, compute_dtype=compute_dtype)

    if state is None:
        # reset_state placeholder (zero state) fused into the kernel epilogue:
        # no separate jnp.zeros_like HBM pass.
        ff, state = base_linear_ff(input_, prepared, tm=tm, emit_state=True)
    else:
        ff = base_linear_ff(input_, prepared, tm=tm, emit_state=False)

    # TODO(synk): activation() is abstract on BaseLinear (defined by spiking
    # subclasses); identity passthrough here.  Concrete subclasses should fuse
    # it into the kernel epilogue (see _make_linear_kernel) on the fp32 acc.
    output = ff
    return state, output


if __name__ == "__main__":
    key = jax.random.PRNGKey(0)
    kx, kw, kx2, kw2 = jax.random.split(key, 4)

    # --- Test 1: small spiking-layer shapes, weight prepared once ----------
    batch, input_size, output_size = 8, 32, 64
    bound = 1.0 / (input_size ** 0.5)           # nn.Linear default init range
    weight = jax.random.uniform(kw, (output_size, input_size), jnp.float32,
                                minval=-bound, maxval=bound)
    x = jax.random.normal(kx, (batch, input_size), jnp.float32)

    w_prep = prepare_weight(weight)             # one-time layout/cast/pad
    state, out = base_linear_forward(None, x, w_prep)
    jax.block_until_ready(out)

    ref_bf16 = jnp.dot(x.astype(jnp.bfloat16), weight.astype(jnp.bfloat16).T,
                       preferred_element_type=jnp.float32)
    assert out.shape == (batch, output_size)
    assert state.shape == (batch, output_size)
    assert np.all(np.asarray(state) == 0.0)
    assert np.allclose(np.asarray(out), np.asarray(ref_bf16),
                       atol=1e-3, rtol=1e-3)
    ref_f32 = np.asarray(x) @ np.asarray(weight).T
    assert np.allclose(np.asarray(out), ref_f32, atol=5e-2, rtol=5e-2)

    # --- Test 2: non-aligned dims + stacked timesteps (padding-aware path) --
    t_steps, batch2, in2, out2 = 4, 10, 200, 300
    bound2 = 1.0 / (in2 ** 0.5)
    weight2 = jax.random.uniform(kw2, (out2, in2), jnp.float32,
                                 minval=-bound2, maxval=bound2)
    x2 = jax.random.normal(kx2, (t_steps, batch2, in2), jnp.float32)

    prev_state = jnp.zeros((t_steps, batch2, out2), jnp.float32)
    state2, out_b = base_linear_forward(prev_state, x2, weight2)
    jax.block_until_ready(out_b)

    ref2_bf16 = jnp.dot(x2.astype(jnp.bfloat16), weight2.astype(jnp.bfloat16).T,
                        preferred_element_type=jnp.float32)
    assert out_b.shape == (t_steps, batch2, out2)
    assert state2 is prev_state
    assert np.allclose(np.asarray(out_b), np.asarray(ref2_bf16),
                       atol=1e-3, rtol=1e-3)

    print("KERNEL_OK")
</pallas_src>

<mosaic_0001>
module attributes {stable_mosaic.version = 11 : i64} {
  func.func @kernel(%arg0: i32, %arg1: i32, %arg2: memref<16x128xbf16, #tpu.memory_space<vmem>>, %arg3: memref<128x128xbf16, #tpu.memory_space<vmem>>, %arg4: memref<16x128xf32, #tpu.memory_space<vmem>>, %arg5: memref<16x128xf32, #tpu.memory_space<vmem>>) attributes {dimension_semantics = [#tpu.dimension_semantics<parallel>, #tpu.dimension_semantics<parallel>], iteration_bounds = array<i64: 1, 1>, scalar_prefetch = 0 : i64, scratch_operands = 0 : i64, tpu.core_type = #tpu.core_type<tc>, window_params = [{transform_indices = @transform_0, window_bounds = array<i64: 16, 128>}, {transform_indices = @transform_1, window_bounds = array<i64: 128, 128>}, {transform_indices = @transform_2, window_bounds = array<i64: 16, 128>}, {transform_indices = @transform_3, window_bounds = array<i64: 16, 128>}]} {
    %c0 = arith.constant 0 : index
    %c0_0 = arith.constant 0 : index
    %0 = vector.load %arg2[%c0, %c0_0] : memref<16x128xbf16, #tpu.memory_space<vmem>>, vector<16x128xbf16>
    %c0_1 = arith.constant 0 : index
    %c0_2 = arith.constant 0 : index
    %1 = vector.load %arg3[%c0_1, %c0_2] : memref<128x128xbf16, #tpu.memory_space<vmem>>, vector<128x128xbf16>
    %cst = arith.constant dense<0.000000e+00> : vector<16x128xf32>
    %2 = tpu.matmul %0, %1, %cst {dimension_numbers = #tpu.dot_dimension_numbers<[1], [0], [0], [1], [0, 0, 1, 1], [], []>} : vector<16x128xbf16>, vector<128x128xbf16>, vector<16x128xf32> -> vector<16x128xf32>
    %c0_3 = arith.constant 0 : index
    %c0_4 = arith.constant 0 : index
    %3 = vector.load %arg4[%c0_3, %c0_4] : memref<16x128xf32, #tpu.memory_space<vmem>>, vector<16x128xf32>
    tpu.vector_store %arg4[%c0_3, %c0_4], %2 {strides = array<i32>} : memref<16x128xf32, #tpu.memory_space<vmem>>, vector<16x128xf32>,
    %cst_5 = arith.constant 0.000000e+00 : f32
    %4 = vector.broadcast %cst_5 : f32 to vector<16x128xf32>
    %c0_6 = arith.constant 0 : index
    %c0_7 = arith.constant 0 : index
    %5 = vector.load %arg5[%c0_6, %c0_7] : memref<16x128xf32, #tpu.memory_space<vmem>>, vector<16x128xf32>
    tpu.vector_store %arg5[%c0_6, %c0_7], %4 {strides = array<i32>} : memref<16x128xf32, #tpu.memory_space<vmem>>, vector<16x128xf32>,
    return
  }
  func.func @transform_0(%arg0: i32, %arg1: i32) -> (i32, i32) {
    %c0_i32 = arith.constant 0 : i32
    %c0_i32_0 = arith.constant 0 : i32
    return %arg0, %c0_i32 : i32, i32
  }
  func.func @transform_1(%arg0: i32, %arg1: i32) -> (i32, i32) {
    %c0_i32 = arith.constant 0 : i32
    %c0_i32_0 = arith.constant 0 : i32
    return %c0_i32, %arg1 : i32, i32
  }
  func.func @transform_2(%arg0: i32, %arg1: i32) -> (i32, i32) {
    %c0_i32 = arith.constant 0 : i32
    return %arg0, %arg1 : i32, i32
  }
  func.func @transform_3(%arg0: i32, %arg1: i32) -> (i32, i32) {
    %c0_i32 = arith.constant 0 : i32
    return %arg0, %arg1 : i32, i32
  }
}

</mosaic_0001>

<bundles_post_ra>
// kernel: tpu_custom_call.1
= control target key start
LH: loop header
LB: loop body
LE: loop exit
PB: predicated region body
PF: predicated region fallthrough
CT: control target
= control target key end

     0   :  { %9 = vsyncpa [#allocation3], 0  ;;  %s426_s0 = inlined_call_operand.hbm [shape: bf16[16,128], index: 0, kind: input, shape index: {}]   ;;  %s427_s1 = inlined_call_operand.hbm [shape: bf16[128,128], index: 1, kind: input, shape index: {}]   ;;  %s428_s2 = inlined_call_operand.hbm [shape: f32[16,128], index: 2, kind: output, shape index: {0}]   ;;  %s429_s3 = inlined_call_operand.hbm [shape: f32[16,128], index: 3, kind: output, shape index: {1}]  }
   0x1   :  { %10 = vsyncpa [#allocation6], 0 }
   0x2   :  { %11 = vsyncpa [#allocation4], 0 }
   0x3   :  { %12 = vsyncpa [#allocation9], 0  ;;  %s348_s12 = smov [#allocation2]   ;;  %s252_s16 = scalar_lea.hbm %s426_s0, 128 }
   0x4   :  { %s18_s13 = sshll.u32 %s348_s12, 4  ;;  %p253_p0 = scmp.ne.s32.totalorder %s426_s0, %s252_s16  ;;  %s19_s13 = int_to_ptr.vmem [resolvable:$true] %s18_s13 }
   0x5   :  { %p256_p1 = scmp.lt.u32.totalorder %s252_s16, %s426_s0 }
   0x7   :  { %p258_p2 = pnand %p256_p1, %p253_p0 }
   0x9   :  { %261 = shalt.err (!%p258_p2)
}
   0xa   :  { %s262_s21 = scalar_lea.vmem %s19_s13, 128  ;;  %p267_p4 = scmp.lt.s32.totalorder %s19_s13, %s19_s13 }
   0xb   :  { %p263_p3 = scmp.ne.s32.totalorder %s19_s13, %s262_s21  ;;  %p268_p5 = scmp.lt.s32.totalorder %s262_s21, %s262_s21 }
   0xd   :  { %p269_p6 = por %p268_p5, %p267_p4 }
   0xf   :  { %p270_p7 = pnand %p269_p6, %p263_p3 }
  0x11   :  { %273 = shalt.err (!%p270_p7)
}
  0x12   :  { %s349_s22 = smov 64   ;;  %s350_s23 = smov 4  }
  0x13   :  { %24 = dma.hbm_to_vmem [thread:$0]  %s426_s0, 128, %s19_s13, [#allocation3], %s349_s22, %s349_s22, %s350_s23  }
  0x14   :  { %s351_s26 = smov [#allocation5]   ;;  %s274_s30 = scalar_lea.hbm %s427_s1, 1024 }
  0x15   :  { %s30_s27 = sshll.u32 %s351_s26, 4  ;;  %p275_p8 = scmp.ne.s32.totalorder %s427_s1, %s274_s30  ;;  %s31_s27 = int_to_ptr.vmem [resolvable:$true] %s30_s27 }
  0x16   :  { %p278_p9 = scmp.lt.u32.totalorder %s274_s30, %s427_s1 }
  0x18   :  { %p280_p10 = pnand %p278_p9, %p275_p8 }
  0x1a   :  { %283 = shalt.err (!%p280_p10)
}
  0x1b   :  { %s284_s8 = scalar_lea.vmem %s31_s27, 1024  ;;  %p289_p12 = scmp.lt.s32.totalorder %s31_s27, %s31_s27 }
  0x1c   :  { %p285_p11 = scmp.ne.s32.totalorder %s31_s27, %s284_s8  ;;  %p290_p13 = scmp.lt.s32.totalorder %s284_s8, %s284_s8 }
  0x1e   :  { %p291_p0 = por %p290_p13, %p289_p12 }
  0x20   :  { %p292_p1 = pnand %p291_p0, %p285_p11 }
  0x22   :  { %295 = shalt.err (!%p292_p1)
}
  0x23   :  { %36 = dma.hbm_to_vmem [thread:$0]  %s427_s1, 1024, %s31_s27, [#allocation6], %s349_s22, %s349_s22, %s350_s23  }
  0x24   :  { %340 = dma.done.wait [#allocation3], 128  }
  0x25   :  { %341 = vsyncadd [#allocation3], 4294967168 }
  0x26   :  { %342 = dma.done.wait [#allocation6], 1024  }
  0x27   :  { %343 = vsyncadd [#allocation6], 4294966272  ;;  %v352_v0 = vmov 0.0   ;;  %vm353_vm0 = vmmov 0   ;;  %v243_v1 = vld [vmem:[#allocation5] sm:$0xff]   ;;  %v244_v2 = vld [vmem:[#allocation5 + $0x8] sm:$0xff]  }
  0x28   :  { %213 = vmatprep.subr.bf16.mxu0 %v352_v0  ;;  %159 = vst [vmem:[#allocation8] sm:$0xff] %v352_v0  ;;  %160 = vst [vmem:[#allocation8 + $0x8] sm:$0xff] %v352_v0  ;;  %229 = vmatprep.mubr.msk.bf16.mxu0 %vm353_vm0, %v352_v0  ;;  %v245_v3 = vld [vmem:[#allocation5 + $0x10] sm:$0xff]   ;;  %v246_v4 = vld [vmem:[#allocation5 + $0x18] sm:$0xff]   ;;  %s354_s1 = smov [#allocation8]  }
  0x29   :  { %214 = vmatpush3.bf16.msra.mxu0 %v243_v1  ;;  %v247_v5 = vld [vmem:[#allocation5 + $0x20] sm:$0xff]   ;;  %v248_v6 = vld [vmem:[#allocation5 + $0x28] sm:$0xff]   ;;  %v249_v7 = vld [vmem:[#allocation5 + $0x30] sm:$0xff]   ;;  %s178_s10 = sshll.u32 %s354_s1, 4  ;;  %s179_s10 = int_to_ptr.vmem [resolvable:$true] %s178_s10 }
  0x2a   :  { %215 = vmatprep.subr.bf16.mxu0 %v352_v0  ;;  %v250_v8 = vld [vmem:[#allocation5 + $0x38] sm:$0xff]   ;;  %s296_s11 = scalar_lea.vmem %s179_s10, 256  ;;  %p301_p3 = scmp.lt.s32.totalorder %s179_s10, %s179_s10 }
  0x2b   :  { %v251_v9 = vld [vmem:[#allocation2] sm:$0xff]   ;;  %p297_p2 = scmp.ne.s32.totalorder %s179_s10, %s296_s11  ;;  %p302_p4 = scmp.lt.s32.totalorder %s296_s11, %s296_s11 }
  0x2d   :  { %216 = vmatpush3.bf16.msra.mxu0 %v244_v2  ;;  %p303_p5 = por %p302_p4, %p301_p3 }
  0x2e   :  { %217 = vmatprep.subr.bf16.mxu0 %v352_v0 }
  0x2f   :  { %p304_p6 = pnand %p303_p5, %p297_p2 }
  0x31   :  { %218 = vmatpush3.bf16.msra.mxu0 %v245_v3 }
  0x32   :  { %219 = vmatprep.subr.bf16.mxu0 %v352_v0 }
  0x35   :  { %220 = vmatpush3.bf16.msra.mxu0 %v246_v4 }
  0x36   :  { %221 = vmatprep.subr.bf16.mxu0 %v352_v0 }
  0x39   :  { %222 = vmatpush3.bf16.msra.mxu0 %v247_v5 }
  0x3a   :  { %223 = vmatprep.subr.bf16.mxu0 %v352_v0 }
  0x3d   :  { %224 = vmatpush3.bf16.msra.mxu0 %v248_v6 }
  0x3e   :  { %225 = vmatprep.subr.bf16.mxu0 %v352_v0 }
  0x41   :  { %226 = vmatpush3.bf16.msra.mxu0 %v249_v7 }
  0x42   :  { %227 = vmatprep.subr.bf16.mxu0 %v352_v0 }
  0x45   :  { %228 = vmatpush3.bf16.msra.mxu0 %v250_v8 }
  0x48   :  { %230 = vmatmul.mubr.bf16.vlgmr.msra.gmra.mrb[0].mxu0 %v251_v9 }
  0x49   :  { %307 = shalt.err (!%p304_p6)
}
  0x4a   :  { %s308_s14 = scalar_lea.hbm %s429_s3, 256 }
  0x4b   :  { %p309_p7 = scmp.ne.s32.totalorder %s429_s3, %s308_s14  ;;  %p312_p8 = scmp.lt.u32.totalorder %s308_s14, %s429_s3 }
  0x4d   :  { %p314_p9 = pnand %p312_p8, %p309_p7 }
  0x4f   :  { %317 = shalt.err (!%p314_p9)
}
  0x50   :  { %s355_s19 = smov 128   ;;  %s356_s20 = smov 8  }
  0x51   :  { %184 = dma.vmem_to_hbm [thread:$0]  %s179_s10, 256, %s429_s3, [#allocation9], %s355_s19, %s355_s19, %s356_s20  }
  0x52   :  { %s357_s23 = smov [#allocation7]  }
  0x53   :  { %s166_s24 = sshll.u32 %s357_s23, 4  ;;  %s167_s24 = int_to_ptr.vmem [resolvable:$true] %s166_s24 }
  0x54   :  { %s318_s25 = scalar_lea.vmem %s167_s24, 256  ;;  %p323_p11 = scmp.lt.s32.totalorder %s167_s24, %s167_s24 }
  0x55   :  { %p319_p10 = scmp.ne.s32.totalorder %s167_s24, %s318_s25  ;;  %p324_p12 = scmp.lt.s32.totalorder %s318_s25, %s318_s25 }
  0x57   :  { %p325_p13 = por %p324_p12, %p323_p11 }
  0x59   :  { %p326_p0 = pnand %p325_p13, %p319_p10 }
 0x11b   :  { %v150_v10 = vpop.f32.mrb[0].mxu0 }
 0x11c   :  { %157 = vst [vmem:[#allocation7] sm:$0xff] %v150_v10  ;;  %v231_v11 = vpop.f32.mrb[1].mxu0 }
 0x11d   :  { %v153_v12 = vpop.f32.mrb[2].mxu0 }
 0x11e   :  { %158 = vst [vmem:[#allocation7 + $0x8] sm:$0xff] %v153_v12  ;;  %v232_v13 = vpop.f32.mrb[3].mxu0 }
 0x11f   :  { %329 = shalt.err (!%p326_p0)
}
 0x120   :  { %s330_s3 = scalar_lea.hbm %s428_s2, 256 }
 0x121   :  { %p331_p1 = scmp.ne.s32.totalorder %s428_s2, %s330_s3  ;;  %p334_p2 = scmp.lt.u32.totalorder %s330_s3, %s428_s2 }
 0x123   :  { %p336_p3 = pnand %p334_p2, %p331_p1 }
 0x125   :  { %339 = shalt.err (!%p336_p3)
}
 0x126   :  { %172 = dma.vmem_to_hbm [thread:$0]  %s167_s24, 256, %s428_s2, [#allocation4], %s355_s19, %s355_s19, %s356_s20  }
 0x127   :  { %344 = dma.done.wait [#allocation4], 256  }
 0x128   :  { %345 = vsyncadd [#allocation4], 4294967040 }
 0x129   :  { %346 = dma.done.wait [#allocation9], 256  }
 0x12a   :  { %347 = vsyncadd [#allocation9], 4294967040 }
 0x12b   :  { %191 = vsyncpa [#allocation3], 1 }
 0x12c   :  { %192 = vsyncpa [#allocation6], 1 }
 0x12d   :  { %193 = vsyncpa [#allocation4], 1 }
 0x12e   :  { %194 = vsyncpa [#allocation9], 1 }

</bundles_post_ra>
